<compile_context>
chip_gen: v6e
topology: v6e:2x2x1
jax: 0.10.0
libtpu: 0.0.40
codegen_flags: <defaults>
</compile_context>

<pallas_src>
import functools
import numpy as np
import jax
import jax.numpy as jnp
from jax import lax
from jax.experimental import pallas as pl
from jax.experimental.pallas import tpu as pltpu


# ----------------------------- EDM config / schedule -----------------------------

class EdmCfg:
    num_steps_denoising = 8
    sigma_min = 2e-3
    sigma_max_sampler = 10.0
    rho = 7
    order = 1
    s_churn = 0.0
    s_tmin = 0.0
    s_tmax = float("inf")
    s_noise = 1.0
    sigma_offset_noise = 1.0
    sigma_data = 1.0


def build_sigma(denoise_steps, sigma_min, sigma_max, rho):
    min_inv_rho = sigma_min ** (1.0 / rho)
    max_inv_rho = sigma_max ** (1.0 / rho)
    l = np.linspace(0.0, 1.0, denoise_steps)
    sigmas = (max_inv_rho + l * (min_inv_rho - max_inv_rho)) ** rho
    return np.concatenate([sigmas, np.zeros(1)]).astype(np.float64)


def make_step_coefs(sigmas, cfg):
    """Per-step scalar table (n_steps, 8), algebraically folded on the host.

    One Euler step of the reference sampler is exactly
        x <- x + churn * eps                       (only if gamma > 0)
        m  = inner_model(x * c_in, c_noise)
        x <- a_x * x + a_m * m
    with a_x = 1 + dt*(1 - c_skip)/sigma_hat,  a_m = -dt*c_out/sigma_hat.
    """
    n_steps = len(sigmas) - 1
    gamma_ = min(cfg.s_churn / max(n_steps, 1), 2 ** 0.5 - 1)
    rows = []
    for k in range(n_steps):
        sigma, next_sigma = float(sigmas[k]), float(sigmas[k + 1])
        gamma = gamma_ if (cfg.s_tmin <= sigma <= cfg.s_tmax) else 0.0
        sigma_hat = sigma * (gamma + 1.0)
        churn = (cfg.s_noise * np.sqrt(max(sigma_hat ** 2 - sigma ** 2, 0.0))
                 if gamma > 0 else 0.0)
        # compute_edm_coef(sigma * s_in): offset-noise-augmented sigma
        so = np.sqrt(sigma ** 2 + cfg.sigma_offset_noise ** 2)
        c_in = 1.0 / np.sqrt(so ** 2 + cfg.sigma_data ** 2)
        c_skip = cfg.sigma_data ** 2 / (so ** 2 + cfg.sigma_data ** 2)
        c_out = so * np.sqrt(c_skip)
        c_noise = np.log(so) / 4.0
        # Euler update: x + dt*(x - denoised)/sigma_hat, dt = next_sigma - sigma_hat
        dt = next_sigma - sigma_hat
        a_x = 1.0 + dt * (1.0 - c_skip) / sigma_hat
        a_m = -dt * c_out / sigma_hat
        rows.append([c_in, c_noise, a_x, a_m, churn, 0.0, 0.0, 0.0])
    return jnp.asarray(np.asarray(rows, dtype=np.float32))


# --------------------------------- Pallas kernel ---------------------------------

def _edm_sample_kernel(coefs_ref, x0_ref, eps_ref, w1_ref, b1_ref, tw_ref,
                       w2_ref, b2_ref, out_ref):
    """Fused EDM Euler sampling loop; x lives in out_ref (VMEM) for all steps.

    coefs_ref (SMEM, f32[n_steps, 8]):
      [:,0]=c_in  [:,1]=c_noise  [:,2]=a_x  [:,3]=a_m  [:,4]=churn_scale
    """
    n_steps = eps_ref.shape[0]

    # Hoist weight loads out of the step loop (loaded from VMEM once).
    w1 = w1_ref[...]
    b1 = b1_ref[...]
    tw = tw_ref[...]
    w2 = w2_ref[...]
    b2 = b2_ref[...]

    # x = randn(...)  (generated wrapper-side, already token-flattened)
    out_ref[...] = x0_ref[...]

    def body(step, carry):
        c_in = coefs_ref[step, 0]
        c_noise = coefs_ref[step, 1]
        a_x = coefs_ref[step, 2]
        a_m = coefs_ref[step, 3]
        churn = coefs_ref[step, 4]

        # s_churn perturbation (scale precomputed; exactly 0 when s_churn == 0)
        x = out_ref[...] + churn * eps_ref[step]

        # Stand-in denoiser: token-wise MLP with c_noise time embedding.
        h = jnp.dot(x * c_in, w1, preferred_element_type=jnp.float32)
        h = jnp.maximum(h + b1 + c_noise * tw, 0.0)
        m = jnp.dot(h, w2, preferred_element_type=jnp.float32) + b2

        # denoised = c_out*m + c_skip*x ; d = (x - denoised)/sigma_hat ; x += d*dt
        # folded into two host-precomputed scalars:
        out_ref[...] = a_x * x + a_m * m
        return carry

    # Short fixed trip count -> fully unrolled for LLO scheduler visibility.
    lax.fori_loop(0, n_steps, body, 0, unroll=True)


def edm_sample_fused(coefs, x0_flat, eps, params):
    BHn, D = x0_flat.shape
    vmem = pltpu.MemorySpace.VMEM
    smem = pltpu.MemorySpace.SMEM
    return pl.pallas_call(
        _edm_sample_kernel,
        out_shape=jax.ShapeDtypeStruct((BHn, D), jnp.float32),
        in_specs=[
            pl.BlockSpec(memory_space=smem),   # per-step scalar table
            pl.BlockSpec(memory_space=vmem),   # x0 (flattened tokens)
            pl.BlockSpec(memory_space=vmem),   # stacked churn noise
            pl.BlockSpec(memory_space=vmem),   # w1
            pl.BlockSpec(memory_space=vmem),   # b1
            pl.BlockSpec(memory_space=vmem),   # tw (time-embedding row)
            pl.BlockSpec(memory_space=vmem),   # w2
            pl.BlockSpec(memory_space=vmem),   # b2
        ],
        out_specs=pl.BlockSpec(memory_space=vmem),
    )(coefs, x0_flat, eps,
      params["w1"], params["b1"], params["tw"], params["w2"], params["b2"])


# ----------------------------- forward == sample(cond) -----------------------------

def edm_value_diffusion_forward(cond0, coefs, params, key, *, horizon, n_steps):
    """EDMValueDiffusion.forward(cond) -> sample(cond): (B, horizon, traj_dim)."""
    B, cond_len, D = cond0.shape
    Hn = horizon - cond_len                      # predict_seq_len
    k_x, k_eps = jax.random.split(key)
    # x = randn(B, predict_seq_len, traj_dim); flatten tokens wrapper-side
    x0 = jax.random.normal(k_x, (B, Hn, D), jnp.float32).reshape(B * Hn, D)
    # all per-step churn noise drawn once (numerically dead when s_churn == 0)
    eps = jax.random.normal(k_eps, (n_steps, B * Hn, D), jnp.float32)
    x = edm_sample_fused(coefs, x0, eps, params)
    # total_traj = torch.cat([cond[0], x], dim=1)
    return jnp.concatenate([cond0, x.reshape(B, Hn, D)], axis=1)


# ---------------------------------------- main ----------------------------------------

if __name__ == "__main__":
    B = 2
    horizon = 8
    cond_length = 2
    observation_dim = 11
    action_dim = 4
    traj_dim = observation_dim + action_dim + 1   # transition_dim = 16
    hidden = 32

    cfg = EdmCfg()
    n_steps = cfg.num_steps_denoising

    sigmas = build_sigma(n_steps, cfg.sigma_min, cfg.sigma_max_sampler, cfg.rho)
    coefs = make_step_coefs(sigmas, cfg)

    key = jax.random.PRNGKey(0)
    k_cond, k_w1, k_w2, k_tw, k_sample = jax.random.split(key, 5)

    # deterministic synthetic weights for the stand-in denoising model
    params = {
        "w1": 0.1 * jax.random.normal(k_w1, (traj_dim, hidden), jnp.float32),
        "b1": jnp.zeros((1, hidden), jnp.float32),
        "tw": 0.01 * jax.random.normal(k_tw, (1, hidden), jnp.float32),
        "w2": 0.1 * jax.random.normal(k_w2, (hidden, traj_dim), jnp.float32),
        "b2": jnp.zeros((1, traj_dim), jnp.float32),
    }

    # cond[0]: (batch, cond_length, traj_dim)
    cond0 = jax.random.normal(k_cond, (B, cond_length, traj_dim), jnp.float32)

    fwd = jax.jit(functools.partial(
        edm_value_diffusion_forward, horizon=horizon, n_steps=n_steps))
    out = jax.block_until_ready(fwd(cond0, coefs, params, k_sample))

    assert out.shape == (B, horizon, traj_dim), out.shape
    assert bool(jnp.all(jnp.isfinite(out)))
    # the conditioning trajectory is prepended unchanged, as in the reference
    assert bool(jnp.allclose(out[:, :cond_length], cond0))
    print("KERNEL_OK")
</pallas_src>

<mosaic_0001>
module attributes {stable_mosaic.version = 11 : i64} {
  func.func @_edm_sample_kernel(%arg0: memref<8x8xf32, #tpu.memory_space<smem>>, %arg1: memref<12x16xf32, #tpu.memory_space<vmem>>, %arg2: memref<8x12x16xf32, #tpu.memory_space<vmem>>, %arg3: memref<16x32xf32, #tpu.memory_space<vmem>>, %arg4: memref<1x32xf32, #tpu.memory_space<vmem>>, %arg5: memref<1x32xf32, #tpu.memory_space<vmem>>, %arg6: memref<32x16xf32, #tpu.memory_space<vmem>>, %arg7: memref<1x16xf32, #tpu.memory_space<vmem>>, %arg8: memref<12x16xf32, #tpu.memory_space<vmem>>) attributes {dimension_semantics = [], scalar_prefetch = 0 : i64, scratch_operands = 0 : i64, tpu.core_type = #tpu.core_type<tc>} {
    %c0 = arith.constant 0 : index
    %c0_0 = arith.constant 0 : index
    %0 = vector.load %arg3[%c0, %c0_0] : memref<16x32xf32, #tpu.memory_space<vmem>>, vector<16x32xf32>
    %c0_1 = arith.constant 0 : index
    %c0_2 = arith.constant 0 : index
    %1 = vector.load %arg4[%c0_1, %c0_2] : memref<1x32xf32, #tpu.memory_space<vmem>>, vector<1x32xf32>
    %c0_3 = arith.constant 0 : index
    %c0_4 = arith.constant 0 : index
    %2 = vector.load %arg5[%c0_3, %c0_4] : memref<1x32xf32, #tpu.memory_space<vmem>>, vector<1x32xf32>
    %c0_5 = arith.constant 0 : index
    %c0_6 = arith.constant 0 : index
    %3 = vector.load %arg6[%c0_5, %c0_6] : memref<32x16xf32, #tpu.memory_space<vmem>>, vector<32x16xf32>
    %c0_7 = arith.constant 0 : index
    %c0_8 = arith.constant 0 : index
    %4 = vector.load %arg7[%c0_7, %c0_8] : memref<1x16xf32, #tpu.memory_space<vmem>>, vector<1x16xf32>
    %c0_9 = arith.constant 0 : index
    %c0_10 = arith.constant 0 : index
    %5 = vector.load %arg1[%c0_9, %c0_10] : memref<12x16xf32, #tpu.memory_space<vmem>>, vector<12x16xf32>
    %c0_11 = arith.constant 0 : index
    %c0_12 = arith.constant 0 : index
    %6 = vector.load %arg8[%c0_11, %c0_12] : memref<12x16xf32, #tpu.memory_space<vmem>>, vector<12x16xf32>
    tpu.vector_store %arg8[%c0_11, %c0_12], %5 {strides = array<i32>} : memref<12x16xf32, #tpu.memory_space<vmem>>, vector<12x16xf32>,
    %c0_i32 = arith.constant 0 : i32
    %7 = arith.index_cast %c0_i32 : i32 to index
    %c0_13 = arith.constant 0 : index
    %8 = memref.load %arg0[%7, %c0_13] : memref<8x8xf32, #tpu.memory_space<smem>>
    %9 = arith.index_cast %c0_i32 : i32 to index
    %c1 = arith.constant 1 : index
    %10 = memref.load %arg0[%9, %c1] : memref<8x8xf32, #tpu.memory_space<smem>>
    %11 = arith.index_cast %c0_i32 : i32 to index
    %c2 = arith.constant 2 : index
    %12 = memref.load %arg0[%11, %c2] : memref<8x8xf32, #tpu.memory_space<smem>>
    %13 = arith.index_cast %c0_i32 : i32 to index
    %c3 = arith.constant 3 : index
    %14 = memref.load %arg0[%13, %c3] : memref<8x8xf32, #tpu.memory_space<smem>>
    %15 = arith.index_cast %c0_i32 : i32 to index
    %c4 = arith.constant 4 : index
    %16 = memref.load %arg0[%15, %c4] : memref<8x8xf32, #tpu.memory_space<smem>>
    %c0_14 = arith.constant 0 : index
    %c0_15 = arith.constant 0 : index
    %17 = vector.load %arg8[%c0_14, %c0_15] : memref<12x16xf32, #tpu.memory_space<vmem>>, vector<12x16xf32>
    %18 = arith.index_cast %c0_i32 : i32 to index
    %c0_16 = arith.constant 0 : index
    %c0_17 = arith.constant 0 : index
    %19 = vector.load %arg2[%18, %c0_16, %c0_17] : memref<8x12x16xf32, #tpu.memory_space<vmem>>, vector<1x12x16xf32>
    %20 = vector.shape_cast %19 : vector<1x12x16xf32> to vector<12x16xf32>
    %21 = vector.broadcast %16 : f32 to vector<12x16xf32>
    %22 = arith.mulf %21, %20 : vector<12x16xf32>
    %23 = arith.addf %17, %22 : vector<12x16xf32>
    %24 = vector.broadcast %8 : f32 to vector<12x16xf32>
    %25 = arith.mulf %23, %24 : vector<12x16xf32>
    %cst = arith.constant dense<0.000000e+00> : vector<12x32xf32>
    %26 = tpu.matmul %25, %0, %cst {dimension_numbers = #tpu.dot_dimension_numbers<[1], [0], [0], [1], [0, 0, 1, 1], [], []>} : vector<12x16xf32>, vector<16x32xf32>, vector<12x32xf32> -> vector<12x32xf32>
    %27 = vector.broadcast %1 : vector<1x32xf32> to vector<12x32xf32>
    %28 = arith.addf %26, %27 : vector<12x32xf32>
    %29 = vector.broadcast %10 : f32 to vector<1x32xf32>
    %30 = arith.mulf %29, %2 : vector<1x32xf32>
    %31 = vector.broadcast %30 : vector<1x32xf32> to vector<12x32xf32>
    %32 = arith.addf %28, %31 : vector<12x32xf32>
    %cst_18 = arith.constant 0.000000e+00 : f32
    %33 = vector.broadcast %cst_18 : f32 to vector<12x32xf32>
    %34 = arith.maximumf %32, %33 : vector<12x32xf32>
    %cst_19 = arith.constant dense<0.000000e+00> : vector<12x16xf32>
    %35 = tpu.matmul %34, %3, %cst_19 {dimension_numbers = #tpu.dot_dimension_numbers<[1], [0], [0], [1], [0, 0, 1, 1], [], []>} : vector<12x32xf32>, vector<32x16xf32>, vector<12x16xf32> -> vector<12x16xf32>
    %36 = vector.broadcast %4 : vector<1x16xf32> to vector<12x16xf32>
    %37 = arith.addf %35, %36 : vector<12x16xf32>
    %38 = vector.broadcast %12 : f32 to vector<12x16xf32>
    %39 = arith.mulf %38, %23 : vector<12x16xf32>
    %40 = vector.broadcast %14 : f32 to vector<12x16xf32>
    %41 = arith.mulf %40, %37 : vector<12x16xf32>
    %42 = arith.addf %39, %41 : vector<12x16xf32>
    %c0_20 = arith.constant 0 : index
    %c0_21 = arith.constant 0 : index
    %43 = vector.load %arg8[%c0_20, %c0_21] : memref<12x16xf32, #tpu.memory_space<vmem>>, vector<12x16xf32>
    tpu.vector_store %arg8[%c0_20, %c0_21], %42 {strides = array<i32>} : memref<12x16xf32, #tpu.memory_space<vmem>>, vector<12x16xf32>,
    %c1_i32 = arith.constant 1 : i32
    %44 = arith.index_cast %c1_i32 : i32 to index
    %c0_22 = arith.constant 0 : index
    %45 = memref.load %arg0[%44, %c0_22] : memref<8x8xf32, #tpu.memory_space<smem>>
    %46 = arith.index_cast %c1_i32 : i32 to index
    %c1_23 = arith.constant 1 : index
    %47 = memref.load %arg0[%46, %c1_23] : memref<8x8xf32, #tpu.memory_space<smem>>
    %48 = arith.index_cast %c1_i32 : i32 to index
    %c2_24 = arith.constant 2 : index
    %49 = memref.load %arg0[%48, %c2_24] : memref<8x8xf32, #tpu.memory_space<smem>>
    %50 = arith.index_cast %c1_i32 : i32 to index
    %c3_25 = arith.constant 3 : index
    %51 = memref.load %arg0[%50, %c3_25] : memref<8x8xf32, #tpu.memory_space<smem>>
    %52 = arith.index_cast %c1_i32 : i32 to index
    %c4_26 = arith.constant 4 : index
    %53 = memref.load %arg0[%52, %c4_26] : memref<8x8xf32, #tpu.memory_space<smem>>
    %c0_27 = arith.constant 0 : index
    %c0_28 = arith.constant 0 : index
    %54 = vector.load %arg8[%c0_27, %c0_28] : memref<12x16xf32, #tpu.memory_space<vmem>>, vector<12x16xf32>
    %55 = arith.index_cast %c1_i32 : i32 to index
    %c0_29 = arith.constant 0 : index
    %c0_30 = arith.constant 0 : index
    %56 = vector.load %arg2[%55, %c0_29, %c0_30] : memref<8x12x16xf32, #tpu.memory_space<vmem>>, vector<1x12x16xf32>
    %57 = vector.shape_cast %56 : vector<1x12x16xf32> to vector<12x16xf32>
    %58 = vector.broadcast %53 : f32 to vector<12x16xf32>
    %59 = arith.mulf %58, %57 : vector<12x16xf32>
    %60 = arith.addf %54, %59 : vector<12x16xf32>
    %61 = vector.broadcast %45 : f32 to vector<12x16xf32>
    %62 = arith.mulf %60, %61 : vector<12x16xf32>
    %cst_31 = arith.constant dense<0.000000e+00> : vector<12x32xf32>
    %63 = tpu.matmul %62, %0, %cst_31 {dimension_numbers = #tpu.dot_dimension_numbers<[1], [0], [0], [1], [0, 0, 1, 1], [], []>} : vector<12x16xf32>, vector<16x32xf32>, vector<12x32xf32> -> vector<12x32xf32>
    %64 = vector.broadcast %1 : vector<1x32xf32> to vector<12x32xf32>
    %65 = arith.addf %63, %64 : vector<12x32xf32>
    %66 = vector.broadcast %47 : f32 to vector<1x32xf32>
    %67 = arith.mulf %66, %2 : vector<1x32xf32>
    %68 = vector.broadcast %67 : vector<1x32xf32> to vector<12x32xf32>
    %69 = arith.addf %65, %68 : vector<12x32xf32>
    %cst_32 = arith.constant 0.000000e+00 : f32
    %70 = vector.broadcast %cst_32 : f32 to vector<12x32xf32>
    %71 = arith.maximumf %69, %70 : vector<12x32xf32>
    %cst_33 = arith.constant dense<0.000000e+00> : vector<12x16xf32>
    %72 = tpu.matmul %71, %3, %cst_33 {dimension_numbers = #tpu.dot_dimension_numbers<[1], [0], [0], [1], [0, 0, 1, 1], [], []>} : vector<12x32xf32>, vector<32x16xf32>, vector<12x16xf32> -> vector<12x16xf32>
    %73 = vector.broadcast %4 : vector<1x16xf32> to vector<12x16xf32>
    %74 = arith.addf %72, %73 : vector<12x16xf32>
    %75 = vector.broadcast %49 : f32 to vector<12x16xf32>
    %76 = arith.mulf %75, %60 : vector<12x16xf32>
    %77 = vector.broadcast %51 : f32 to vector<12x16xf32>
    %78 = arith.mulf %77, %74 : vector<12x16xf32>
    %79 = arith.addf %76, %78 : vector<12x16xf32>
    %c0_34 = arith.constant 0 : index
    %c0_35 = arith.constant 0 : index
    %80 = vector.load %arg8[%c0_34, %c0_35] : memref<12x16xf32, #tpu.memory_space<vmem>>, vector<12x16xf32>
    tpu.vector_store %arg8[%c0_34, %c0_35], %79 {strides = array<i32>} : memref<12x16xf32, #tpu.memory_space<vmem>>, vector<12x16xf32>,
    %c2_i32 = arith.constant 2 : i32
    %81 = arith.index_cast %c2_i32 : i32 to index
    %c0_36 = arith.constant 0 : index
    %82 = memref.load %arg0[%81, %c0_36] : memref<8x8xf32, #tpu.memory_space<smem>>
    %83 = arith.index_cast %c2_i32 : i32 to index
    %c1_37 = arith.constant 1 : index
    %84 = memref.load %arg0[%83, %c1_37] : memref<8x8xf32, #tpu.memory_space<smem>>
    %85 = arith.index_cast %c2_i32 : i32 to index
    %c2_38 = arith.constant 2 : index
    %86 = memref.load %arg0[%85, %c2_38] : memref<8x8xf32, #tpu.memory_space<smem>>
    %87 = arith.index_cast %c2_i32 : i32 to index
    %c3_39 = arith.constant 3 : index
    %88 = memref.load %arg0[%87, %c3_39] : memref<8x8xf32, #tpu.memory_space<smem>>
    %89 = arith.index_cast %c2_i32 : i32 to index
    %c4_40 = arith.constant 4 : index
    %90 = memref.load %arg0[%89, %c4_40] : memref<8x8xf32, #tpu.memory_space<smem>>
    %c0_41 = arith.constant 0 : index
    %c0_42 = arith.constant 0 : index
    %91 = vector.load %arg8[%c0_41, %c0_42] : memref<12x16xf32, #tpu.memory_space<vmem>>, vector<12x16xf32>
    %92 = arith.index_cast %c2_i32 : i32 to index
    %c0_43 = arith.constant 0 : index
    %c0_44 = arith.constant 0 : index
    %93 = vector.load %arg2[%92, %c0_43, %c0_44] : memref<8x12x16xf32, #tpu.memory_space<vmem>>, vector<1x12x16xf32>
    %94 = vector.shape_cast %93 : vector<1x12x16xf32> to vector<12x16xf32>
    %95 = vector.broadcast %90 : f32 to vector<12x16xf32>
    %96 = arith.mulf %95, %94 : vector<12x16xf32>
    %97 = arith.addf %91, %96 : vector<12x16xf32>
    %98 = vector.broadcast %82 : f32 to vector<12x16xf32>
    %99 = arith.mulf %97, %98 : vector<12x16xf32>
    %cst_45 = arith.constant dense<0.000000e+00> : vector<12x32xf32>
    %100 = tpu.matmul %99, %0, %cst_45 {dimension_numbers = #tpu.dot_dimension_numbers<[1], [0], [0], [1], [0, 0, 1, 1], [], []>} : vector<12x16xf32>, vector<16x32xf32>, vector<12x32xf32> -> vector<12x32xf32>
    %101 = vector.broadcast %1 : vector<1x32xf32> to vector<12x32xf32>
    %102 = arith.addf %100, %101 : vector<12x32xf32>
    %103 = vector.broadcast %84 : f32 to vector<1x32xf32>
    %104 = arith.mulf %103, %2 : vector<1x32xf32>
    %105 = vector.broadcast %104 : vector<1x32xf32> to vector<12x32xf32>
    %106 = arith.addf %102, %105 : vector<12x32xf32>
    %cst_46 = arith.constant 0.000000e+00 : f32
    %107 = vector.broadcast %cst_46 : f32 to vector<12x32xf32>
    %108 = arith.maximumf %106, %107 : vector<12x32xf32>
    %cst_47 = arith.constant dense<0.000000e+00> : vector<12x16xf32>
    %109 = tpu.matmul %108, %3, %cst_47 {dimension_numbers = #tpu.dot_dimension_numbers<[1], [0], [0], [1], [0, 0, 1, 1], [], []>} : vector<12x32xf32>, vector<32x16xf32>, vector<12x16xf32> -> vector<12x16xf32>
    %110 = vector.broadcast %4 : vector<1x16xf32> to vector<12x16xf32>
    %111 = arith.addf %109, %110 : vector<12x16xf32>
    %112 = vector.broadcast %86 : f32 to vector<12x16xf32>
    %113 = arith.mulf %112, %97 : vector<12x16xf32>
    %114 = vector.broadcast %88 : f32 to vector<12x16xf32>
    %115 = arith.mulf %114, %111 : vector<12x16xf32>
    %116 = arith.addf %113, %115 : vector<12x16xf32>
    %c0_48 = arith.constant 0 : index
    %c0_49 = arith.constant 0 : index
    %117 = vector.load %arg8[%c0_48, %c0_49] : memref<12x16xf32, #tpu.memory_space<vmem>>, vector<12x16xf32>
    tpu.vector_store %arg8[%c0_48, %c0_49], %116 {strides = array<i32>} : memref<12x16xf32, #tpu.memory_space<vmem>>, vector<12x16xf32>,
    %c3_i32 = arith.constant 3 : i32
    %118 = arith.index_cast %c3_i32 : i32 to index
    %c0_50 = arith.constant 0 : index
    %119 = memref.load %arg0[%118, %c0_50] : memref<8x8xf32, #tpu.memory_space<smem>>
    %120 = arith.index_cast %c3_i32 : i32 to index
    %c1_51 = arith.constant 1 : index
    %121 = memref.load %arg0[%120, %c1_51] : memref<8x8xf32, #tpu.memory_space<smem>>
    %122 = arith.index_cast %c3_i32 : i32 to index
    %c2_52 = arith.constant 2 : index
    %123 = memref.load %arg0[%122, %c2_52] : memref<8x8xf32, #tpu.memory_space<smem>>
    %124 = arith.index_cast %c3_i32 : i32 to index
    %c3_53 = arith.constant 3 : index
    %125 = memref.load %arg0[%124, %c3_53] : memref<8x8xf32, #tpu.memory_space<smem>>
    %126 = arith.index_cast %c3_i32 : i32 to index
    %c4_54 = arith.constant 4 : index
    %127 = memref.load %arg0[%126, %c4_54] : memref<8x8xf32, #tpu.memory_space<smem>>
    %c0_55 = arith.constant 0 : index
    %c0_56 = arith.constant 0 : index
    %128 = vector.load %arg8[%c0_55, %c0_56] : memref<12x16xf32, #tpu.memory_space<vmem>>, vector<12x16xf32>
    %129 = arith.index_cast %c3_i32 : i32 to index
    %c0_57 = arith.constant 0 : index
    %c0_58 = arith.constant 0 : index
    %130 = vector.load %arg2[%129, %c0_57, %c0_58] : memref<8x12x16xf32, #tpu.memory_space<vmem>>, vector<1x12x16xf32>
    %131 = vector.shape_cast %130 : vector<1x12x16xf32> to vector<12x16xf32>
    %132 = vector.broadcast %127 : f32 to vector<12x16xf32>
    %133 = arith.mulf %132, %131 : vector<12x16xf32>
    %134 = arith.addf %128, %133 : vector<12x16xf32>
    %135 = vector.broadcast %119 : f32 to vector<12x16xf32>
    %136 = arith.mulf %134, %135 : vector<12x16xf32>
    %cst_59 = arith.constant dense<0.000000e+00> : vector<12x32xf32>
    %137 = tpu.matmul %136, %0, %cst_59 {dimension_numbers = #tpu.dot_dimension_numbers<[1], [0], [0], [1], [0, 0, 1, 1], [], []>} : vector<12x16xf32>, vector<16x32xf32>, vector<12x32xf32> -> vector<12x32xf32>
    %138 = vector.broadcast %1 : vector<1x32xf32> to vector<12x32xf32>
    %139 = arith.addf %137, %138 : vector<12x32xf32>
    %140 = vector.broadcast %121 : f32 to vector<1x32xf32>
    %141 = arith.mulf %140, %2 : vector<1x32xf32>
    %142 = vector.broadcast %141 : vector<1x32xf32> to vector<12x32xf32>
    %143 = arith.addf %139, %142 : vector<12x32xf32>
    %cst_60 = arith.constant 0.000000e+00 : f32
    %144 = vector.broadcast %cst_60 : f32 to vector<12x32xf32>
    %145 = arith.maximumf %143, %144 : vector<12x32xf32>
    %cst_61 = arith.constant dense<0.000000e+00> : vector<12x16xf32>
    %146 = tpu.matmul %145, %3, %cst_61 {dimension_numbers = #tpu.dot_dimension_numbers<[1], [0], [0], [1], [0, 0, 1, 1], [], []>} : vector<12x32xf32>, vector<32x16xf32>, vector<12x16xf32> -> vector<12x16xf32>
    %147 = vector.broadcast %4 : vector<1x16xf32> to vector<12x16xf32>
    %148 = arith.addf %146, %147 : vector<12x16xf32>
    %149 = vector.broadcast %123 : f32 to vector<12x16xf32>
    %150 = arith.mulf %149, %134 : vector<12x16xf32>
    %151 = vector.broadcast %125 : f32 to vector<12x16xf32>
    %152 = arith.mulf %151, %148 : vector<12x16xf32>
    %153 = arith.addf %150, %152 : vector<12x16xf32>
    %c0_62 = arith.constant 0 : index
    %c0_63 = arith.constant 0 : index
    %154 = vector.load %arg8[%c0_62, %c0_63] : memref<12x16xf32, #tpu.memory_space<vmem>>, vector<12x16xf32>
    tpu.vector_store %arg8[%c0_62, %c0_63], %153 {strides = array<i32>} : memref<12x16xf32, #tpu.memory_space<vmem>>, vector<12x16xf32>,
    %c4_i32 = arith.constant 4 : i32
    %155 = arith.index_cast %c4_i32 : i32 to index
    %c0_64 = arith.constant 0 : index
    %156 = memref.load %arg0[%155, %c0_64] : memref<8x8xf32, #tpu.memory_space<smem>>
    %157 = arith.index_cast %c4_i32 : i32 to index
    %c1_65 = arith.constant 1 : index
    %158 = memref.load %arg0[%157, %c1_65] : memref<8x8xf32, #tpu.memory_space<smem>>
    %159 = arith.index_cast %c4_i32 : i32 to index
    %c2_66 = arith.constant 2 : index
    %160 = memref.load %arg0[%159, %c2_66] : memref<8x8xf32, #tpu.memory_space<smem>>
    %161 = arith.index_cast %c4_i32 : i32 to index
    %c3_67 = arith.constant 3 : index
    %162 = memref.load %arg0[%161, %c3_67] : memref<8x8xf32, #tpu.memory_space<smem>>
    %163 = arith.index_cast %c4_i32 : i32 to index
    %c4_68 = arith.constant 4 : index
    %164 = memref.load %arg0[%163, %c4_68] : memref<8x8xf32, #tpu.memory_space<smem>>
    %c0_69 = arith.constant 0 : index
    %c0_70 = arith.constant 0 : index
    %165 = vector.load %arg8[%c0_69, %c0_70] : memref<12x16xf32, #tpu.memory_space<vmem>>, vector<12x16xf32>
    %166 = arith.index_cast %c4_i32 : i32 to index
    %c0_71 = arith.constant 0 : index
    %c0_72 = arith.constant 0 : index
    %167 = vector.load %arg2[%166, %c0_71, %c0_72] : memref<8x12x16xf32, #tpu.memory_space<vmem>>, vector<1x12x16xf32>
    %168 = vector.shape_cast %167 : vector<1x12x16xf32> to vector<12x16xf32>
    %169 = vector.broadcast %164 : f32 to vector<12x16xf32>
    %170 = arith.mulf %169, %168 : vector<12x16xf32>
    %171 = arith.addf %165, %170 : vector<12x16xf32>
    %172 = vector.broadcast %156 : f32 to vector<12x16xf32>
    %173 = arith.mulf %171, %172 : vector<12x16xf32>
    %cst_73 = arith.constant dense<0.000000e+00> : vector<12x32xf32>
    %174 = tpu.matmul %173, %0, %cst_73 {dimension_numbers = #tpu.dot_dimension_numbers<[1], [0], [0], [1], [0, 0, 1, 1], [], []>} : vector<12x16xf32>, vector<16x32xf32>, vector<12x32xf32> -> vector<12x32xf32>
    %175 = vector.broadcast %1 : vector<1x32xf32> to vector<12x32xf32>
    %176 = arith.addf %174, %175 : vector<12x32xf32>
    %177 = vector.broadcast %158 : f32 to vector<1x32xf32>
    %178 = arith.mulf %177, %2 : vector<1x32xf32>
    %179 = vector.broadcast %178 : vector<1x32xf32> to vector<12x32xf32>
    %180 = arith.addf %176, %179 : vector<12x32xf32>
    %cst_74 = arith.constant 0.000000e+00 : f32
    %181 = vector.broadcast %cst_74 : f32 to vector<12x32xf32>
    %182 = arith.maximumf %180, %181 : vector<12x32xf32>
    %cst_75 = arith.constant dense<0.000000e+00> : vector<12x16xf32>
    %183 = tpu.matmul %182, %3, %cst_75 {dimension_numbers = #tpu.dot_dimension_numbers<[1], [0], [0], [1], [0, 0, 1, 1], [], []>} : vector<12x32xf32>, vector<32x16xf32>, vector<12x16xf32> -> vector<12x16xf32>
    %184 = vector.broadcast %4 : vector<1x16xf32> to vector<12x16xf32>
    %185 = arith.addf %183, %184 : vector<12x16xf32>
    %186 = vector.broadcast %160 : f32 to vector<12x16xf32>
    %187 = arith.mulf %186, %171 : vector<12x16xf32>
    %188 = vector.broadcast %162 : f32 to vector<12x16xf32>
    %189 = arith.mulf %188, %185 : vector<12x16xf32>
    %190 = arith.addf %187, %189 : vector<12x16xf32>
    %c0_76 = arith.constant 0 : index
    %c0_77 = arith.constant 0 : index
    %191 = vector.load %arg8[%c0_76, %c0_77] : memref<12x16xf32, #tpu.memory_space<vmem>>, vector<12x16xf32>
    tpu.vector_store %arg8[%c0_76, %c0_77], %190 {strides = array<i32>} : memref<12x16xf32, #tpu.memory_space<vmem>>, vector<12x16xf32>,
    %c5_i32 = arith.constant 5 : i32
    %192 = arith.index_cast %c5_i32 : i32 to index
    %c0_78 = arith.constant 0 : index
    %193 = memref.load %arg0[%192, %c0_78] : memref<8x8xf32, #tpu.memory_space<smem>>
    %194 = arith.index_cast %c5_i32 : i32 to index
    %c1_79 = arith.constant 1 : index
    %195 = memref.load %arg0[%194, %c1_79] : memref<8x8xf32, #tpu.memory_space<smem>>
    %196 = arith.index_cast %c5_i32 : i32 to index
    %c2_80 = arith.constant 2 : index
    %197 = memref.load %arg0[%196, %c2_80] : memref<8x8xf32, #tpu.memory_space<smem>>
    %198 = arith.index_cast %c5_i32 : i32 to index
    %c3_81 = arith.constant 3 : index
    %199 = memref.load %arg0[%198, %c3_81] : memref<8x8xf32, #tpu.memory_space<smem>>
    %200 = arith.index_cast %c5_i32 : i32 to index
    %c4_82 = arith.constant 4 : index
    %201 = memref.load %arg0[%200, %c4_82] : memref<8x8xf32, #tpu.memory_space<smem>>
    %c0_83 = arith.constant 0 : index
    %c0_84 = arith.constant 0 : index
    %202 = vector.load %arg8[%c0_83, %c0_84] : memref<12x16xf32, #tpu.memory_space<vmem>>, vector<12x16xf32>
    %203 = arith.index_cast %c5_i32 : i32 to index
    %c0_85 = arith.constant 0 : index
    %c0_86 = arith.constant 0 : index
    %204 = vector.load %arg2[%203, %c0_85, %c0_86] : memref<8x12x16xf32, #tpu.memory_space<vmem>>, vector<1x12x16xf32>
    %205 = vector.shape_cast %204 : vector<1x12x16xf32> to vector<12x16xf32>
    %206 = vector.broadcast %201 : f32 to vector<12x16xf32>
    %207 = arith.mulf %206, %205 : vector<12x16xf32>
    %208 = arith.addf %202, %207 : vector<12x16xf32>
    %209 = vector.broadcast %193 : f32 to vector<12x16xf32>
    %210 = arith.mulf %208, %209 : vector<12x16xf32>
    %cst_87 = arith.constant dense<0.000000e+00> : vector<12x32xf32>
    %211 = tpu.matmul %210, %0, %cst_87 {dimension_numbers = #tpu.dot_dimension_numbers<[1], [0], [0], [1], [0, 0, 1, 1], [], []>} : vector<12x16xf32>, vector<16x32xf32>, vector<12x32xf32> -> vector<12x32xf32>
    %212 = vector.broadcast %1 : vector<1x32xf32> to vector<12x32xf32>
    %213 = arith.addf %211, %212 : vector<12x32xf32>
    %214 = vector.broadcast %195 : f32 to vector<1x32xf32>
    %215 = arith.mulf %214, %2 : vector<1x32xf32>
    %216 = vector.broadcast %215 : vector<1x32xf32> to vector<12x32xf32>
    %217 = arith.addf %213, %216 : vector<12x32xf32>
    %cst_88 = arith.constant 0.000000e+00 : f32
    %218 = vector.broadcast %cst_88 : f32 to vector<12x32xf32>
    %219 = arith.maximumf %217, %218 : vector<12x32xf32>
    %cst_89 = arith.constant dense<0.000000e+00> : vector<12x16xf32>
    %220 = tpu.matmul %219, %3, %cst_89 {dimension_numbers = #tpu.dot_dimension_numbers<[1], [0], [0], [1], [0, 0, 1, 1], [], []>} : vector<12x32xf32>, vector<32x16xf32>, vector<12x16xf32> -> vector<12x16xf32>
    %221 = vector.broadcast %4 : vector<1x16xf32> to vector<12x16xf32>
    %222 = arith.addf %220, %221 : vector<12x16xf32>
    %223 = vector.broadcast %197 : f32 to vector<12x16xf32>
    %224 = arith.mulf %223, %208 : vector<12x16xf32>
    %225 = vector.broadcast %199 : f32 to vector<12x16xf32>
    %226 = arith.mulf %225, %222 : vector<12x16xf32>
    %227 = arith.addf %224, %226 : vector<12x16xf32>
    %c0_90 = arith.constant 0 : index
    %c0_91 = arith.constant 0 : index
    %228 = vector.load %arg8[%c0_90, %c0_91] : memref<12x16xf32, #tpu.memory_space<vmem>>, vector<12x16xf32>
    tpu.vector_store %arg8[%c0_90, %c0_91], %227 {strides = array<i32>} : memref<12x16xf32, #tpu.memory_space<vmem>>, vector<12x16xf32>,
    %c6_i32 = arith.constant 6 : i32
    %229 = arith.index_cast %c6_i32 : i32 to index
    %c0_92 = arith.constant 0 : index
    %230 = memref.load %arg0[%229, %c0_92] : memref<8x8xf32, #tpu.memory_space<smem>>
    %231 = arith.index_cast %c6_i32 : i32 to index
    %c1_93 = arith.constant 1 : index
    %232 = memref.load %arg0[%231, %c1_93] : memref<8x8xf32, #tpu.memory_space<smem>>
    %233 = arith.index_cast %c6_i32 : i32 to index
    %c2_94 = arith.constant 2 : index
    %234 = memref.load %arg0[%233, %c2_94] : memref<8x8xf32, #tpu.memory_space<smem>>
    %235 = arith.index_cast %c6_i32 : i32 to index
    %c3_95 = arith.constant 3 : index
    %236 = memref.load %arg0[%235, %c3_95] : memref<8x8xf32, #tpu.memory_space<smem>>
    %237 = arith.index_cast %c6_i32 : i32 to index
    %c4_96 = arith.constant 4 : index
    %238 = memref.load %arg0[%237, %c4_96] : memref<8x8xf32, #tpu.memory_space<smem>>
    %c0_97 = arith.constant 0 : index
    %c0_98 = arith.constant 0 : index
    %239 = vector.load %arg8[%c0_97, %c0_98] : memref<12x16xf32, #tpu.memory_space<vmem>>, vector<12x16xf32>
    %240 = arith.index_cast %c6_i32 : i32 to index
    %c0_99 = arith.constant 0 : index
    %c0_100 = arith.constant 0 : index
    %241 = vector.load %arg2[%240, %c0_99, %c0_100] : memref<8x12x16xf32, #tpu.memory_space<vmem>>, vector<1x12x16xf32>
    %242 = vector.shape_cast %241 : vector<1x12x16xf32> to vector<12x16xf32>
    %243 = vector.broadcast %238 : f32 to vector<12x16xf32>
    %244 = arith.mulf %243, %242 : vector<12x16xf32>
    %245 = arith.addf %239, %244 : vector<12x16xf32>
    %246 = vector.broadcast %230 : f32 to vector<12x16xf32>
    %247 = arith.mulf %245, %246 : vector<12x16xf32>
    %cst_101 = arith.constant dense<0.000000e+00> : vector<12x32xf32>
    %248 = tpu.matmul %247, %0, %cst_101 {dimension_numbers = #tpu.dot_dimension_numbers<[1], [0], [0], [1], [0, 0, 1, 1], [], []>} : vector<12x16xf32>, vector<16x32xf32>, vector<12x32xf32> -> vector<12x32xf32>
    %249 = vector.broadcast %1 : vector<1x32xf32> to vector<12x32xf32>
    %250 = arith.addf %248, %249 : vector<12x32xf32>
    %251 = vector.broadcast %232 : f32 to vector<1x32xf32>
    %252 = arith.mulf %251, %2 : vector<1x32xf32>
    %253 = vector.broadcast %252 : vector<1x32xf32> to vector<12x32xf32>
    %254 = arith.addf %250, %253 : vector<12x32xf32>
    %cst_102 = arith.constant 0.000000e+00 : f32
    %255 = vector.broadcast %cst_102 : f32 to vector<12x32xf32>
    %256 = arith.maximumf %254, %255 : vector<12x32xf32>
    %cst_103 = arith.constant dense<0.000000e+00> : vector<12x16xf32>
    %257 = tpu.matmul %256, %3, %cst_103 {dimension_numbers = #tpu.dot_dimension_numbers<[1], [0], [0], [1], [0, 0, 1, 1], [], []>} : vector<12x32xf32>, vector<32x16xf32>, vector<12x16xf32> -> vector<12x16xf32>
    %258 = vector.broadcast %4 : vector<1x16xf32> to vector<12x16xf32>
    %259 = arith.addf %257, %258 : vector<12x16xf32>
    %260 = vector.broadcast %234 : f32 to vector<12x16xf32>
    %261 = arith.mulf %260, %245 : vector<12x16xf32>
    %262 = vector.broadcast %236 : f32 to vector<12x16xf32>
    %263 = arith.mulf %262, %259 : vector<12x16xf32>
    %264 = arith.addf %261, %263 : vector<12x16xf32>
    %c0_104 = arith.constant 0 : index
    %c0_105 = arith.constant 0 : index
    %265 = vector.load %arg8[%c0_104, %c0_105] : memref<12x16xf32, #tpu.memory_space<vmem>>, vector<12x16xf32>
    tpu.vector_store %arg8[%c0_104, %c0_105], %264 {strides = array<i32>} : memref<12x16xf32, #tpu.memory_space<vmem>>, vector<12x16xf32>,
    %c7_i32 = arith.constant 7 : i32
    %266 = arith.index_cast %c7_i32 : i32 to index
    %c0_106 = arith.constant 0 : index
    %267 = memref.load %arg0[%266, %c0_106] : memref<8x8xf32, #tpu.memory_space<smem>>
    %268 = arith.index_cast %c7_i32 : i32 to index
    %c1_107 = arith.constant 1 : index
    %269 = memref.load %arg0[%268, %c1_107] : memref<8x8xf32, #tpu.memory_space<smem>>
    %270 = arith.index_cast %c7_i32 : i32 to index
    %c2_108 = arith.constant 2 : index
    %271 = memref.load %arg0[%270, %c2_108] : memref<8x8xf32, #tpu.memory_space<smem>>
    %272 = arith.index_cast %c7_i32 : i32 to index
    %c3_109 = arith.constant 3 : index
    %273 = memref.load %arg0[%272, %c3_109] : memref<8x8xf32, #tpu.memory_space<smem>>
    %274 = arith.index_cast %c7_i32 : i32 to index
    %c4_110 = arith.constant 4 : index
    %275 = memref.load %arg0[%274, %c4_110] : memref<8x8xf32, #tpu.memory_space<smem>>
    %c0_111 = arith.constant 0 : index
    %c0_112 = arith.constant 0 : index
    %276 = vector.load %arg8[%c0_111, %c0_112] : memref<12x16xf32, #tpu.memory_space<vmem>>, vector<12x16xf32>
    %277 = arith.index_cast %c7_i32 : i32 to index
    %c0_113 = arith.constant 0 : index
    %c0_114 = arith.constant 0 : index
    %278 = vector.load %arg2[%277, %c0_113, %c0_114] : memref<8x12x16xf32, #tpu.memory_space<vmem>>, vector<1x12x16xf32>
    %279 = vector.shape_cast %278 : vector<1x12x16xf32> to vector<12x16xf32>
    %280 = vector.broadcast %275 : f32 to vector<12x16xf32>
    %281 = arith.mulf %280, %279 : vector<12x16xf32>
    %282 = arith.addf %276, %281 : vector<12x16xf32>
    %283 = vector.broadcast %267 : f32 to vector<12x16xf32>
    %284 = arith.mulf %282, %283 : vector<12x16xf32>
    %cst_115 = arith.constant dense<0.000000e+00> : vector<12x32xf32>
    %285 = tpu.matmul %284, %0, %cst_115 {dimension_numbers = #tpu.dot_dimension_numbers<[1], [0], [0], [1], [0, 0, 1, 1], [], []>} : vector<12x16xf32>, vector<16x32xf32>, vector<12x32xf32> -> vector<12x32xf32>
    %286 = vector.broadcast %1 : vector<1x32xf32> to vector<12x32xf32>
    %287 = arith.addf %285, %286 : vector<12x32xf32>
    %288 = vector.broadcast %269 : f32 to vector<1x32xf32>
    %289 = arith.mulf %288, %2 : vector<1x32xf32>
    %290 = vector.broadcast %289 : vector<1x32xf32> to vector<12x32xf32>
    %291 = arith.addf %287, %290 : vector<12x32xf32>
    %cst_116 = arith.constant 0.000000e+00 : f32
    %292 = vector.broadcast %cst_116 : f32 to vector<12x32xf32>
    %293 = arith.maximumf %291, %292 : vector<12x32xf32>
    %cst_117 = arith.constant dense<0.000000e+00> : vector<12x16xf32>
    %294 = tpu.matmul %293, %3, %cst_117 {dimension_numbers = #tpu.dot_dimension_numbers<[1], [0], [0], [1], [0, 0, 1, 1], [], []>} : vector<12x32xf32>, vector<32x16xf32>, vector<12x16xf32> -> vector<12x16xf32>
    %295 = vector.broadcast %4 : vector<1x16xf32> to vector<12x16xf32>
    %296 = arith.addf %294, %295 : vector<12x16xf32>
    %297 = vector.broadcast %271 : f32 to vector<12x16xf32>
    %298 = arith.mulf %297, %282 : vector<12x16xf32>
    %299 = vector.broadcast %273 : f32 to vector<12x16xf32>
    %300 = arith.mulf %299, %296 : vector<12x16xf32>
    %301 = arith.addf %298, %300 : vector<12x16xf32>
    %c0_118 = arith.constant 0 : index
    %c0_119 = arith.constant 0 : index
    %302 = vector.load %arg8[%c0_118, %c0_119] : memref<12x16xf32, #tpu.memory_space<vmem>>, vector<12x16xf32>
    tpu.vector_store %arg8[%c0_118, %c0_119], %301 {strides = array<i32>} : memref<12x16xf32, #tpu.memory_space<vmem>>, vector<12x16xf32>,
    %c8_i32 = arith.constant 8 : i32
    return
  }
}

</mosaic_0001>

<bundles_post_ra>
// kernel: edm_value_diffusion_forward.3
= control target key start
LH: loop header
LB: loop body
LE: loop exit
PB: predicated region body
PF: predicated region fallthrough
CT: control target
= control target key end

     0   :  { %13 = vsyncpa [#allocation3], 0  ;;  %s2462_s0 = inlined_call_operand.vmem [shape: f32[8,8], index: 0, kind: input, shape index: {}]   ;;  %s2463_s1 = inlined_call_operand.vmem [shape: f32[12,16], index: 1, kind: input, shape index: {}]   ;;  %s2464_s2 = inlined_call_operand.vmem [shape: f32[8,12,16], index: 2, kind: input, shape index: {}]   ;;  %s2465_s3 = inlined_call_operand.vmem [shape: f32[16,32], index: 3, kind: input, shape index: {}]   ;;  %s2466_s4 = inlined_call_operand.vmem [shape: f32[1,32], index: 4, kind: input, shape index: {}]   ;;  %s2467_s5 = inlined_call_operand.vmem [shape: f32[1,32], index: 5, kind: input, shape index: {}]   ;;  %s2468_s6 = inlined_call_operand.vmem [shape: f32[32,16], index: 6, kind: input, shape index: {}]   ;;  %s2469_s7 = inlined_call_operand.vmem [shape: f32[1,16], index: 7, kind: input, shape index: {}]   ;;  %s2470_s8 = inlined_call_operand.vmem [shape: f32[12,16], index: 8, kind: output, shape index: {}]  }
   0x1   :  { %s20_s29 = sshll.u32 %s2462_s0, 4  ;;  %s21_s29 = int_to_ptr.vmem [resolvable:$true] %s20_s29 }
   0x2   :  { %s2002_s30 = scalar_lea.vmem %s21_s29, 128  ;;  %p2007_p1 = scmp.lt.s32.totalorder %s21_s29, %s21_s29 }
   0x3   :  { %p2003_p0 = scmp.ne.s32.totalorder %s21_s29, %s2002_s30  ;;  %p2008_p2 = scmp.lt.s32.totalorder %s2002_s30, %s2002_s30 }
   0x5   :  { %p2009_p3 = por %p2008_p2, %p2007_p1 }
   0x7   :  { %p2010_p4 = pnand %p2009_p3, %p2003_p0 }
   0x9   :  { %2013 = shalt.err (!%p2010_p4)
}
   0xa   :  { %s2016_s9 = smov [#allocation2]  }
   0xb   :  { %23 = dma.vmem_to_smem %s21_s29, 128, %s2016_s9, [#allocation3]  }
   0xc   :  { %2014 = dma.done.wait [#allocation3], 128  }
   0xd   :  { %2015 = vsyncadd [#allocation3], 4294967168 }
   0xe   :  { %41 = sfence }
   0xf   :  { %v2068_v0 = vld [vmem:[%s2465_s3 + $0x8] sm:$0xff]  ;;  %v2073_v1 = vld [vmem:[%s2465_s3] sm:$0xff]  ;;  %vm53_vm0 = vcmask 130048   ;;  %vm55_vm1 = vcmask 125952   ;;  %s57_s20 = sld [smem:[#allocation2]]  ;;  %v2114_v16 = vld [vmem:[%s2468_s6 + $0x18] sm:$0xff]  ;;  %v164_v20 = vlaneseq }
  0x10   :  { %v51_v2 = vld [vmem:[%s2463_s1] sm:$0xff]  ;;  %1857 = vmatprep.subr.mxu1 %v2068_v0  ;;  %v52_v3 = vld [vmem:[%s2463_s1 + $0x8] sm:$0xf]  ;;  %1875 = vmatprep.subr.mxu0 %v2068_v0  ;;  %s1693_s1 = sld [smem:[#allocation2 + $0x4]]  ;;  %v2122_v17 = vld [vmem:[%s2468_s6 + $0x10] sm:$0xff]  ;;  %vm179_vm2 = vcmask 261120  }
  0x11   :  { %54 = vst.msk [vmem:[%s2470_s8] sm:$0xff] %vm53_vm0, %v51_v2  ;;  %1858 = vmatpush3.msra.mxu1 %v2068_v0  ;;  %1876 = vmatpush3.msra.mxu0 %v2068_v0  ;;  %v64_v4 = vld [vmem:[%s2464_s2] sm:$0xff]  ;;  %v65_v5 = vld [vmem:[%s2464_s2 + $0x8] sm:$0xf]  ;;  %s1690_s14 = sld [smem:[#allocation2 + $0x1]]  ;;  %v165_v21 = vshrl.u32 %v164_v20, 7 }
  0x12   :  { %56 = vst.msk [vmem:[%s2470_s8 + $0x8] sm:$0xf] %vm55_vm1, %v52_v3  ;;  %1859 = vmatprep.subr.mxu1 %v2073_v1  ;;  %1877 = vmatprep.subr.mxu0 %v2073_v1  ;;  %v2129_v18 = vld [vmem:[%s2468_s6 + $0x8] sm:$0xff]  ;;  %v2136_v19 = vld [vmem:[%s2468_s6] sm:$0xff]  ;;  %s1704_s19 = sld [smem:[#allocation2 + $0x84]]  ;;  %v1705_v51 = vld [vmem:[%s2464_s2 + $0x10] sm:$0xff] }
  0x13   :  { %1860 = vmatpush3.msra.mxu1 %v2073_v1  ;;  %1878 = vmatpush3.msra.mxu0 %v2073_v1  ;;  %v2144_v22 = vld [vmem:[%s2467_s5] sm:$0x1]  ;;  %v2147_v25 = vsub.s32 0, %v165_v21  ;;  %s1692_s5 = sld [smem:[#allocation2 + $0x3]]  ;;  %v1706_v49 = vld [vmem:[%s2464_s2 + $0x18] sm:$0xf] }
  0x14   :  { %1864 = vmatprep.subr.mxu1 %v2114_v16  ;;  %1882 = vmatprep.subr.mxu0 %v2114_v16  ;;  %v2152_v26 = vld [vmem:[%s2466_s4] ss:$0 sm:$0xff]  ;;  %s1691_s4 = sld [smem:[#allocation2 + $0x2]] }
  0x15   :  { %v71_v11 = vstv %s57_s20  ;;  %v2166_v37 = vld [vmem:[%s2469_s7] ss:$0 sm:$0xff]  ;;  %s1700_s22 = sld [smem:[#allocation2 + $0x80]] }
  0x16   :  { %v66_v8 = vstv %s1693_s1  ;;  %s1701_s9 = sld [smem:[#allocation2 + $0x81]] }
  0x17   :  { %v67_v9 = vmul.f32 %v66_v8, %v64_v4  ;;  %v68_v10 = vmul.f32 %v66_v8, %v65_v5  ;;  %v161_v23 = vstv %s1690_s14  ;;  %s1702_s10 = sld [smem:[#allocation2 + $0x82]] }
  0x18   :  { %v62_v6 = vld [vmem:[%s2470_s8] sm:$0xff]  ;;  %v162_v24 = vmul.f32 %v161_v23, %v2144_v22  ;;  %v281_v50 = vstv %s1704_s19  ;;  %s1703_s11 = sld [smem:[#allocation2 + $0x83]] }
  0x19   :  { %v63_v7 = vld [vmem:[%s2470_s8 + $0x8] sm:$0xf]  ;;  %v69_v12 = vadd.f32 %v67_v9, %v62_v6  ;;  %v264_v39 = vstv %s1692_s5  ;;  %v283_v52 = vmul.f32 %v1706_v49, %v281_v50  ;;  %v282_v53 = vmul.f32 %v1705_v51, %v281_v50  ;;  %s1715_s12 = sld [smem:[#allocation2 + $0x104]] }
  0x1a   :  { %v70_v13 = vadd.f32 %v68_v10, %v63_v7  ;;  %v167_v28 = vrot.slane %v162_v24, %v2147_v25  ;;  %v261_v36 = vstv %s1691_s4  ;;  %s1711_s16 = sld [smem:[#allocation2 + $0x100]] }
  0x1b   :  { %v72_v14 = vmul.f32 %v71_v11, %v69_v12  ;;  %v262_v43 = vmul.f32 %v261_v36, %v69_v12  ;;  %v286_v58 = vstv %s1700_s22  ;;  %s1712_s1 = sld [smem:[#allocation2 + $0x101]] }
  0x1c   :  { %v73_v15 = vmul.f32 %v71_v11, %v70_v13  ;;  %v263_v41 = vmul.f32 %v261_v36, %v70_v13  ;;  %v370_v61 = vstv %s1701_s9  ;;  %s1713_s7 = sld [smem:[#allocation2 + $0x102]] }
  0x1d   :  { %1861 = vmatprep.mubr.msk.f32.mxu1 %vm53_vm0, %v72_v14  ;;  %v371_v62 = vmul.f32 %v370_v61, %v2144_v22  ;;  %v463_v10 = vstv %s1702_s10  ;;  %s1714_s21 = sld [smem:[#allocation2 + $0x103]] }
  0x1e   :  { %1862 = vmatmul.mubr.msk.f32.vlgmr.msra.gmra.mxu1 %vm53_vm0, %v73_v15  ;;  %v466_v12 = vstv %s1703_s11  ;;  %s1726_s22 = sld [smem:[#allocation2 + $0x184]] }
  0x1f   :  { %1865 = vmatpush3.msra.mxu1 %v2114_v16  ;;  %v376_v2 = vrot.slane %v371_v62, %v2147_v25  ;;  %s1722_s27 = sld [smem:[#allocation2 + $0x180]] }
  0x20   :  { %1866 = vmatprep.subr.mxu1 %v2122_v17  ;;  %s1723_s13 = sld [smem:[#allocation2 + $0x181]] }
  0x21   :  { %1867 = vmatpush3.msra.mxu1 %v2122_v17  ;;  %s1724_s14 = sld [smem:[#allocation2 + $0x182]] }
  0x22   :  { %1868 = vmatprep.subr.mxu1 %v2129_v18  ;;  %s1725_s15 = sld [smem:[#allocation2 + $0x183]] }
  0x23   :  { %1869 = vmatpush3.msra.mxu1 %v2129_v18  ;;  %s1733_s18 = sld [smem:[#allocation2 + $0x200]] }
  0x24   :  { %1870 = vmatprep.subr.mxu1 %v2136_v19  ;;  %s1734_s24 = sld [smem:[#allocation2 + $0x201]] }
  0x25   :  { %1871 = vmatpush3.msra.mxu1 %v2136_v19  ;;  %s1735_s25 = sld [smem:[#allocation2 + $0x202]] }
  0x26   :  { %1893 = vmatprep.subr.mxu1 %v2068_v0  ;;  %s1736_s26 = sld [smem:[#allocation2 + $0x203]] }
  0x27   :  { %s1744_s10 = sld [smem:[#allocation2 + $0x280]] }
  0x28   :  { %s1745_s17 = sld [smem:[#allocation2 + $0x281]] }
  0x29   :  { %s1746_s4 = sld [smem:[#allocation2 + $0x282]] }
  0x2a   :  { %s1747_s5 = sld [smem:[#allocation2 + $0x283]] }
  0x2b   :  { %s1756_s29 = sld [smem:[#allocation2 + $0x301]] }
  0x2c   :  { %s1757_s30 = sld [smem:[#allocation2 + $0x302]] }
  0x2d   :  { %s1758_s9 = sld [smem:[#allocation2 + $0x303]] }
  0x2e   :  { %s1768_s19 = sld [smem:[#allocation2 + $0x382]] }
  0x2f   :  { %s1769_s20 = sld [smem:[#allocation2 + $0x383]] }
  0xde   :  { %v1863_v27 = vpop.f32.mrf.mxu1 }
  0xdf   :  { %v158_v29 = vadd.f32 %v1863_v27, %v2152_v26 }
  0xe0   :  { %v152_v30 = vpop.f32.mrf.mxu1 }
  0xe1   :  { %v153_v31 = vadd.f32 %v2152_v26, %v152_v30  ;;  %v170_v32 = vadd.f32 %v167_v28, %v158_v29  ;;  %v1717_v29 = vld [vmem:[%s2464_s2 + $0x28] sm:$0xf]  ;;  %v483_v30 = vstv %s1715_s12 }
  0xe3   :  { %v169_v33 = vadd.f32 %v167_v28, %v153_v31  ;;  %v172_v35 = vmax.f32 %v170_v32, 0.0  ;;  %v1716_v31 = vld [vmem:[%s2464_s2 + $0x20] sm:$0xff]  ;;  %v485_v32 = vmul.f32 %v1717_v29, %v483_v30 }
  0xe5   :  { %v171_v34 = vmax.f32 %v169_v33, 0.0  ;;  %v484_v33 = vmul.f32 %v1716_v31, %v483_v30 }
  0xe7   :  { %1872 = vmatprep.mubr.msk.f32.mxu1 %vm179_vm2, %v171_v34 }
  0xe8   :  { %1873 = vmatmul.mubr.msk.f32.vlgmr.msra.gmra.mxu1 %vm179_vm2, %v172_v35 }
  0xe9   :  { %1894 = vmatpush3.msra.mxu1 %v2068_v0 }
  0xea   :  { %1895 = vmatprep.subr.mxu1 %v2073_v1 }
  0xeb   :  { %1896 = vmatpush3.msra.mxu1 %v2073_v1 }
  0xec   :  { %1900 = vmatprep.subr.mxu1 %v2114_v16 }
 0x1a8   :  { %v1874_v38 = vpop.f32.mrf.mxu1 }
 0x1a9   :  { %v258_v40 = vadd.f32 %v1874_v38, %v2166_v37 }
 0x1aa   :  { %v252_v42 = vpop.f32.mrf.mxu1 }
 0x1ab   :  { %v266_v44 = vmul.f32 %v264_v39, %v258_v40  ;;  %v253_v45 = vadd.f32 %v2166_v37, %v252_v42  ;;  %v572_v42 = vstv %s1712_s1 }
 0x1ad   :  { %v268_v46 = vadd.f32 %v266_v44, %v263_v41  ;;  %v265_v47 = vmul.f32 %v264_v39, %v253_v45  ;;  %v488_v39 = vstv %s1711_s16  ;;  %s1737_s16 = sld [smem:[#allocation2 + $0x204]] }
 0x1af   :  { %270 = vst.msk [vmem:[%s2470_s8 + $0x8] sm:$0xf] %vm55_vm1, %v268_v46  ;;  %v267_v48 = vadd.f32 %v265_v47, %v262_v43  ;;  %v573_v43 = vmul.f32 %v572_v42, %v2144_v22 }
 0x1b1   :  { %269 = vst.msk [vmem:[%s2470_s8] sm:$0xff] %vm53_vm0, %v267_v48  ;;  %v578_v45 = vrot.slane %v573_v43, %v2147_v25 }
 0x1b6   :  { %v277_v54 = vld [vmem:[%s2470_s8 + $0x8] sm:$0xf] }
 0x1b7   :  { %v285_v56 = vadd.f32 %v283_v52, %v277_v54  ;;  %v665_v54 = vstv %s1713_s7  ;;  %s1755_s7 = sld [smem:[#allocation2 + $0x300]] }
 0x1b8   :  { %v276_v55 = vld [vmem:[%s2470_s8] sm:$0xff] }
 0x1b9   :  { %v284_v57 = vadd.f32 %v282_v53, %v276_v55  ;;  %v288_v60 = vmul.f32 %v286_v58, %v285_v56  ;;  %v465_v15 = vmul.f32 %v463_v10, %v285_v56  ;;  %v668_v55 = vstv %s1714_s21 }
 0x1bb   :  { %v287_v59 = vmul.f32 %v286_v58, %v284_v57  ;;  %v464_v23 = vmul.f32 %v463_v10, %v284_v57 }
 0x1bd   :  { %1879 = vmatprep.mubr.msk.f32.mxu0 %vm53_vm0, %v287_v59 }
 0x1be   :  { %1880 = vmatmul.mubr.msk.f32.vlgmr.msra.gmra.mxu0 %vm53_vm0, %v288_v60 }
 0x1bf   :  { %1883 = vmatpush3.msra.mxu0 %v2114_v16 }
 0x1c0   :  { %1884 = vmatprep.subr.mxu0 %v2122_v17 }
 0x1c1   :  { %1885 = vmatpush3.msra.mxu0 %v2122_v17 }
 0x1c2   :  { %1886 = vmatprep.subr.mxu0 %v2129_v18 }
 0x1c3   :  { %1887 = vmatpush3.msra.mxu0 %v2129_v18 }
 0x1c4   :  { %1888 = vmatprep.subr.mxu0 %v2136_v19 }
 0x1c5   :  { %1889 = vmatpush3.msra.mxu0 %v2136_v19 }
 0x1c6   :  { %1911 = vmatprep.subr.mxu0 %v2068_v0 }
 0x27e   :  { %v1881_v63 = vpop.f32.mrf.mxu0 }
 0x27f   :  { %v367_v3 = vadd.f32 %v1881_v63, %v2152_v26 }
 0x280   :  { %v361_v4 = vpop.f32.mrf.mxu0 }
 0x281   :  { %v362_v5 = vadd.f32 %v2152_v26, %v361_v4  ;;  %v379_v6 = vadd.f32 %v376_v2, %v367_v3  ;;  %v1728_v3 = vld [vmem:[%s2464_s2 + $0x38] sm:$0xf]  ;;  %v685_v4 = vstv %s1726_s22 }
 0x283   :  { %v378_v7 = vadd.f32 %v376_v2, %v362_v5  ;;  %v381_v9 = vmax.f32 %v379_v6, 0.0  ;;  %v1727_v5 = vld [vmem:[%s2464_s2 + $0x30] sm:$0xff]  ;;  %v687_v6 = vmul.f32 %v1728_v3, %v685_v4 }
 0x285   :  { %v380_v8 = vmax.f32 %v378_v7, 0.0  ;;  %v686_v7 = vmul.f32 %v1727_v5, %v685_v4 }
 0x287   :  { %1890 = vmatprep.mubr.msk.f32.mxu0 %vm179_vm2, %v380_v8 }
 0x288   :  { %1891 = vmatmul.mubr.msk.f32.vlgmr.msra.gmra.mxu0 %vm179_vm2, %v381_v9 }
 0x289   :  { %1912 = vmatpush3.msra.mxu0 %v2068_v0 }
 0x28a   :  { %1913 = vmatprep.subr.mxu0 %v2073_v1 }
 0x28b   :  { %1914 = vmatpush3.msra.mxu0 %v2073_v1 }
 0x28c   :  { %1918 = vmatprep.subr.mxu0 %v2114_v16 }
 0x348   :  { %v1892_v11 = vpop.f32.mrf.mxu0 }
 0x349   :  { %v460_v13 = vadd.f32 %v1892_v11, %v2166_v37 }
 0x34a   :  { %v454_v14 = vpop.f32.mrf.mxu0 }
 0x34b   :  { %v468_v20 = vmul.f32 %v466_v12, %v460_v13  ;;  %v455_v21 = vadd.f32 %v2166_v37, %v454_v14 }
 0x34d   :  { %v470_v24 = vadd.f32 %v468_v20, %v465_v15  ;;  %v467_v27 = vmul.f32 %v466_v12, %v455_v21  ;;  %v690_v12 = vstv %s1722_s27  ;;  %v774_v15 = vstv %s1723_s13  ;;  %s1748_s27 = sld [smem:[#allocation2 + $0x284]] }
 0x34e   :  { %v775_v20 = vmul.f32 %v774_v15, %v2144_v22 }
 0x34f   :  { %472 = vst.msk [vmem:[%s2470_s8 + $0x8] sm:$0xf] %vm55_vm1, %v470_v24  ;;  %v469_v28 = vadd.f32 %v467_v27, %v464_v23 }
 0x350   :  { %v780_v23 = vrot.slane %v775_v20, %v2147_v25 }
 0x351   :  { %471 = vst.msk [vmem:[%s2470_s8] sm:$0xff] %vm53_vm0, %v469_v28 }
 0x356   :  { %v479_v34 = vld [vmem:[%s2470_s8 + $0x8] sm:$0xf] }
 0x357   :  { %v487_v36 = vadd.f32 %v485_v32, %v479_v34  ;;  %v867_v34 = vstv %s1724_s14  ;;  %s1766_s14 = sld [smem:[#allocation2 + $0x380]] }
 0x358   :  { %v478_v35 = vld [vmem:[%s2470_s8] sm:$0xff] }
 0x359   :  { %v486_v38 = vadd.f32 %v484_v33, %v478_v35  ;;  %v490_v41 = vmul.f32 %v488_v39, %v487_v36  ;;  %v667_v58 = vmul.f32 %v665_v54, %v487_v36  ;;  %v870_v35 = vstv %s1725_s15 }
 0x35b   :  { %v489_v40 = vmul.f32 %v488_v39, %v486_v38  ;;  %v666_v62 = vmul.f32 %v665_v54, %v486_v38 }
 0x35d   :  { %1897 = vmatprep.mubr.msk.f32.mxu1 %vm53_vm0, %v489_v40 }
 0x35e   :  { %1898 = vmatmul.mubr.msk.f32.vlgmr.msra.gmra.mxu1 %vm53_vm0, %v490_v41 }
 0x35f   :  { %1901 = vmatpush3.msra.mxu1 %v2114_v16 }
 0x360   :  { %1902 = vmatprep.subr.mxu1 %v2122_v17 }
 0x361   :  { %1903 = vmatpush3.msra.mxu1 %v2122_v17 }
 0x362   :  { %1904 = vmatprep.subr.mxu1 %v2129_v18 }
 0x363   :  { %1905 = vmatpush3.msra.mxu1 %v2129_v18 }
 0x364   :  { %1906 = vmatprep.subr.mxu1 %v2136_v19 }
 0x365   :  { %1907 = vmatpush3.msra.mxu1 %v2136_v19 }
 0x366   :  { %1929 = vmatprep.subr.mxu1 %v2068_v0 }
 0x41e   :  { %v1899_v44 = vpop.f32.mrf.mxu1 }
 0x41f   :  { %v569_v46 = vadd.f32 %v1899_v44, %v2152_v26 }
 0x420   :  { %v563_v47 = vpop.f32.mrf.mxu1 }
 0x421   :  { %v564_v48 = vadd.f32 %v2152_v26, %v563_v47  ;;  %v581_v49 = vadd.f32 %v578_v45, %v569_v46  ;;  %v1739_v46 = vld [vmem:[%s2464_s2 + $0x48] sm:$0xf]  ;;  %v887_v47 = vstv %s1737_s16 }
 0x423   :  { %v580_v50 = vadd.f32 %v578_v45, %v564_v48  ;;  %v583_v52 = vmax.f32 %v581_v49, 0.0  ;;  %v1738_v48 = vld [vmem:[%s2464_s2 + $0x40] sm:$0xff]  ;;  %v889_v49 = vmul.f32 %v1739_v46, %v887_v47 }
 0x425   :  { %v582_v51 = vmax.f32 %v580_v50, 0.0  ;;  %v888_v50 = vmul.f32 %v1738_v48, %v887_v47 }
 0x427   :  { %1908 = vmatprep.mubr.msk.f32.mxu1 %vm179_vm2, %v582_v51 }
 0x428   :  { %1909 = vmatmul.mubr.msk.f32.vlgmr.msra.gmra.mxu1 %vm179_vm2, %v583_v52 }
 0x429   :  { %1930 = vmatpush3.msra.mxu1 %v2068_v0 }
 0x42a   :  { %1931 = vmatprep.subr.mxu1 %v2073_v1 }
 0x42b   :  { %1932 = vmatpush3.msra.mxu1 %v2073_v1 }
 0x42c   :  { %1936 = vmatprep.subr.mxu1 %v2114_v16 }
 0x4e8   :  { %v1910_v53 = vpop.f32.mrf.mxu1 }
 0x4e9   :  { %v662_v56 = vadd.f32 %v1910_v53, %v2166_v37 }
 0x4ea   :  { %v656_v57 = vpop.f32.mrf.mxu1 }
 0x4eb   :  { %v670_v59 = vmul.f32 %v668_v55, %v662_v56  ;;  %v657_v60 = vadd.f32 %v2166_v37, %v656_v57 }
 0x4ed   :  { %v672_v61 = vadd.f32 %v670_v59, %v667_v58  ;;  %v669_v63 = vmul.f32 %v668_v55, %v657_v60  ;;  %v892_v55 = vstv %s1733_s18  ;;  %v976_v58 = vstv %s1734_s24  ;;  %s1759_s18 = sld [smem:[#allocation2 + $0x304]] }
 0x4ee   :  { %v977_v59 = vmul.f32 %v976_v58, %v2144_v22 }
 0x4ef   :  { %674 = vst.msk [vmem:[%s2470_s8 + $0x8] sm:$0xf] %vm55_vm1, %v672_v61  ;;  %v671_v2 = vadd.f32 %v669_v63, %v666_v62 }
 0x4f0   :  { %v982_v61 = vrot.slane %v977_v59, %v2147_v25 }
 0x4f1   :  { %673 = vst.msk [vmem:[%s2470_s8] sm:$0xff] %vm53_vm0, %v671_v2 }
 0x4f6   :  { %v681_v8 = vld [vmem:[%s2470_s8 + $0x8] sm:$0xf] }
 0x4f7   :  { %v689_v10 = vadd.f32 %v687_v6, %v681_v8  ;;  %v1069_v8 = vstv %s1735_s25 }
 0x4f8   :  { %v680_v9 = vld [vmem:[%s2470_s8] sm:$0xff] }
 0x4f9   :  { %v688_v11 = vadd.f32 %v686_v7, %v680_v9  ;;  %v692_v14 = vmul.f32 %v690_v12, %v689_v10  ;;  %v869_v39 = vmul.f32 %v867_v34, %v689_v10  ;;  %v1072_v9 = vstv %s1736_s26 }
 0x4fb   :  { %v691_v13 = vmul.f32 %v690_v12, %v688_v11  ;;  %v868_v43 = vmul.f32 %v867_v34, %v688_v11 }
 0x4fd   :  { %1915 = vmatprep.mubr.msk.f32.mxu0 %vm53_vm0, %v691_v13 }
 0x4fe   :  { %1916 = vmatmul.mubr.msk.f32.vlgmr.msra.gmra.mxu0 %vm53_vm0, %v692_v14 }
 0x4ff   :  { %1919 = vmatpush3.msra.mxu0 %v2114_v16 }
 0x500   :  { %1920 = vmatprep.subr.mxu0 %v2122_v17 }
 0x501   :  { %1921 = vmatpush3.msra.mxu0 %v2122_v17 }
 0x502   :  { %1922 = vmatprep.subr.mxu0 %v2129_v18 }
 0x503   :  { %1923 = vmatpush3.msra.mxu0 %v2129_v18 }
 0x504   :  { %1924 = vmatprep.subr.mxu0 %v2136_v19 }
 0x505   :  { %1925 = vmatpush3.msra.mxu0 %v2136_v19 }
 0x506   :  { %1947 = vmatprep.subr.mxu0 %v2068_v0 }
 0x5be   :  { %v1917_v21 = vpop.f32.mrf.mxu0 }
 0x5bf   :  { %v771_v24 = vadd.f32 %v1917_v21, %v2152_v26 }
 0x5c0   :  { %v765_v27 = vpop.f32.mrf.mxu0 }
 0x5c1   :  { %v766_v28 = vadd.f32 %v2152_v26, %v765_v27  ;;  %v783_v29 = vadd.f32 %v780_v23, %v771_v24  ;;  %v1750_v24 = vld [vmem:[%s2464_s2 + $0x58] sm:$0xf]  ;;  %v1089_v27 = vstv %s1748_s27 }
 0x5c3   :  { %v782_v30 = vadd.f32 %v780_v23, %v766_v28  ;;  %v785_v32 = vmax.f32 %v783_v29, 0.0  ;;  %v1749_v28 = vld [vmem:[%s2464_s2 + $0x50] sm:$0xff]  ;;  %v1091_v29 = vmul.f32 %v1750_v24, %v1089_v27 }
 0x5c5   :  { %v784_v31 = vmax.f32 %v782_v30, 0.0  ;;  %v1090_v30 = vmul.f32 %v1749_v28, %v1089_v27 }
 0x5c7   :  { %1926 = vmatprep.mubr.msk.f32.mxu0 %vm179_vm2, %v784_v31 }
 0x5c8   :  { %1927 = vmatmul.mubr.msk.f32.vlgmr.msra.gmra.mxu0 %vm179_vm2, %v785_v32 }
 0x5c9   :  { %1948 = vmatpush3.msra.mxu0 %v2068_v0 }
 0x5ca   :  { %1949 = vmatprep.subr.mxu0 %v2073_v1 }
 0x5cb   :  { %1950 = vmatpush3.msra.mxu0 %v2073_v1 }
 0x5cc   :  { %1954 = vmatprep.subr.mxu0 %v2114_v16 }
 0x688   :  { %v1928_v33 = vpop.f32.mrf.mxu0 }
 0x689   :  { %v864_v36 = vadd.f32 %v1928_v33, %v2166_v37 }
 0x68a   :  { %v858_v38 = vpop.f32.mrf.mxu0 }
 0x68b   :  { %v872_v40 = vmul.f32 %v870_v35, %v864_v36  ;;  %v859_v41 = vadd.f32 %v2166_v37, %v858_v38 }
 0x68d   :  { %v874_v42 = vadd.f32 %v872_v40, %v869_v39  ;;  %v871_v44 = vmul.f32 %v870_v35, %v859_v41  ;;  %v1094_v35 = vstv %s1744_s10  ;;  %v1178_v39 = vstv %s1745_s17  ;;  %s1770_s10 = sld [smem:[#allocation2 + $0x384]] }
 0x68e   :  { %v1179_v40 = vmul.f32 %v1178_v39, %v2144_v22 }
 0x68f   :  { %876 = vst.msk [vmem:[%s2470_s8 + $0x8] sm:$0xf] %vm55_vm1, %v874_v42  ;;  %v873_v45 = vadd.f32 %v871_v44, %v868_v43 }
 0x690   :  { %v1184_v42 = vrot.slane %v1179_v40, %v2147_v25 }
 0x691   :  { %875 = vst.msk [vmem:[%s2470_s8] sm:$0xff] %vm53_vm0, %v873_v45 }
 0x696   :  { %v883_v51 = vld [vmem:[%s2470_s8 + $0x8] sm:$0xf] }
 0x697   :  { %v891_v53 = vadd.f32 %v889_v49, %v883_v51  ;;  %v1271_v51 = vstv %s1746_s4 }
 0x698   :  { %v882_v52 = vld [vmem:[%s2470_s8] sm:$0xff] }
 0x699   :  { %v890_v54 = vadd.f32 %v888_v50, %v882_v52  ;;  %v894_v57 = vmul.f32 %v892_v55, %v891_v53  ;;  %v1071_v12 = vmul.f32 %v1069_v8, %v891_v53  ;;  %v1274_v52 = vstv %s1747_s5 }
 0x69b   :  { %v893_v56 = vmul.f32 %v892_v55, %v890_v54  ;;  %v1070_v20 = vmul.f32 %v1069_v8, %v890_v54 }
 0x69d   :  { %1933 = vmatprep.mubr.msk.f32.mxu1 %vm53_vm0, %v893_v56 }
 0x69e   :  { %1934 = vmatmul.mubr.msk.f32.vlgmr.msra.gmra.mxu1 %vm53_vm0, %v894_v57 }
 0x69f   :  { %1937 = vmatpush3.msra.mxu1 %v2114_v16 }
 0x6a0   :  { %1938 = vmatprep.subr.mxu1 %v2122_v17 }
 0x6a1   :  { %1939 = vmatpush3.msra.mxu1 %v2122_v17 }
 0x6a2   :  { %1940 = vmatprep.subr.mxu1 %v2129_v18 }
 0x6a3   :  { %1941 = vmatpush3.msra.mxu1 %v2129_v18 }
 0x6a4   :  { %1942 = vmatprep.subr.mxu1 %v2136_v19 }
 0x6a5   :  { %1943 = vmatpush3.msra.mxu1 %v2136_v19 }
 0x6a6   :  { %1965 = vmatprep.subr.mxu1 %v2068_v0 }
 0x75e   :  { %v1935_v60 = vpop.f32.mrf.mxu1 }
 0x75f   :  { %v973_v62 = vadd.f32 %v1935_v60, %v2152_v26  ;;  %v1761_v60 = vld [vmem:[%s2464_s2 + $0x68] sm:$0xf] }
 0x760   :  { %v967_v63 = vpop.f32.mrf.mxu1 }
 0x761   :  { %v968_v2 = vadd.f32 %v2152_v26, %v967_v63  ;;  %v985_v3 = vadd.f32 %v982_v61, %v973_v62  ;;  %v1760_v62 = vld [vmem:[%s2464_s2 + $0x60] sm:$0xff] }
 0x763   :  { %v984_v4 = vadd.f32 %v982_v61, %v968_v2  ;;  %v987_v6 = vmax.f32 %v985_v3, 0.0  ;;  %v1291_v61 = vstv %s1759_s18 }
 0x764   :  { %v1293_v63 = vmul.f32 %v1761_v60, %v1291_v61  ;;  %v1292_v2 = vmul.f32 %v1760_v62, %v1291_v61 }
 0x765   :  { %v986_v5 = vmax.f32 %v984_v4, 0.0 }
 0x767   :  { %1944 = vmatprep.mubr.msk.f32.mxu1 %vm179_vm2, %v986_v5 }
 0x768   :  { %1945 = vmatmul.mubr.msk.f32.vlgmr.msra.gmra.mxu1 %vm179_vm2, %v987_v6 }
 0x769   :  { %1966 = vmatpush3.msra.mxu1 %v2068_v0 }
 0x76a   :  { %1967 = vmatprep.subr.mxu1 %v2073_v1 }
 0x76b   :  { %1968 = vmatpush3.msra.mxu1 %v2073_v1 }
 0x76c   :  { %1972 = vmatprep.subr.mxu1 %v2114_v16 }
 0x828   :  { %v1946_v7 = vpop.f32.mrf.mxu1 }
 0x829   :  { %v1066_v10 = vadd.f32 %v1946_v7, %v2166_v37  ;;  %v1296_v7 = vstv %s1755_s7 }
 0x82a   :  { %v1060_v11 = vpop.f32.mrf.mxu1 }
 0x82b   :  { %v1074_v13 = vmul.f32 %v1072_v9, %v1066_v10  ;;  %v1061_v14 = vadd.f32 %v2166_v37, %v1060_v11  ;;  %v1380_v10 = vstv %s1756_s29 }
 0x82c   :  { %v1381_v11 = vmul.f32 %v1380_v10, %v2144_v22 }
 0x82d   :  { %v1076_v15 = vadd.f32 %v1074_v13, %v1071_v12  ;;  %v1073_v21 = vmul.f32 %v1072_v9, %v1061_v14 }
 0x82e   :  { %v1386_v13 = vrot.slane %v1381_v11, %v2147_v25 }
 0x82f   :  { %1078 = vst.msk [vmem:[%s2470_s8 + $0x8] sm:$0xf] %vm55_vm1, %v1076_v15  ;;  %v1075_v23 = vadd.f32 %v1073_v21, %v1070_v20 }
 0x831   :  { %1077 = vst.msk [vmem:[%s2470_s8] sm:$0xff] %vm53_vm0, %v1075_v23 }
 0x836   :  { %v1085_v31 = vld [vmem:[%s2470_s8 + $0x8] sm:$0xf] }
 0x837   :  { %v1093_v33 = vadd.f32 %v1091_v29, %v1085_v31  ;;  %v1473_v29 = vstv %s1757_s30 }
 0x838   :  { %v1084_v32 = vld [vmem:[%s2470_s8] sm:$0xff] }
 0x839   :  { %v1092_v34 = vadd.f32 %v1090_v30, %v1084_v32  ;;  %v1096_v38 = vmul.f32 %v1094_v35, %v1093_v33  ;;  %v1273_v55 = vmul.f32 %v1271_v51, %v1093_v33  ;;  %v1476_v30 = vstv %s1758_s9 }
 0x83b   :  { %v1095_v36 = vmul.f32 %v1094_v35, %v1092_v34  ;;  %v1272_v58 = vmul.f32 %v1271_v51, %v1092_v34 }
 0x83d   :  { %1951 = vmatprep.mubr.msk.f32.mxu0 %vm53_vm0, %v1095_v36 }
 0x83e   :  { %1952 = vmatmul.mubr.msk.f32.vlgmr.msra.gmra.mxu0 %vm53_vm0, %v1096_v38 }
 0x83f   :  { %1955 = vmatpush3.msra.mxu0 %v2114_v16 }
 0x840   :  { %1956 = vmatprep.subr.mxu0 %v2122_v17 }
 0x841   :  { %1957 = vmatpush3.msra.mxu0 %v2122_v17 }
 0x842   :  { %1958 = vmatprep.subr.mxu0 %v2129_v18 }
 0x843   :  { %1959 = vmatpush3.msra.mxu0 %v2129_v18 }
 0x844   :  { %1960 = vmatprep.subr.mxu0 %v2136_v19 }
 0x845   :  { %1961 = vmatpush3.msra.mxu0 %v2136_v19 }
 0x846   :  { %1983 = vmatprep.subr.mxu0 %v2068_v0 }
 0x8fe   :  { %v1953_v41 = vpop.f32.mrf.mxu0 }
 0x8ff   :  { %v1175_v43 = vadd.f32 %v1953_v41, %v2152_v26  ;;  %v1772_v41 = vld [vmem:[%s2464_s2 + $0x78] sm:$0xf] }
 0x900   :  { %v1169_v44 = vpop.f32.mrf.mxu0 }
 0x901   :  { %v1170_v45 = vadd.f32 %v2152_v26, %v1169_v44  ;;  %v1187_v46 = vadd.f32 %v1184_v42, %v1175_v43  ;;  %v1771_v43 = vld [vmem:[%s2464_s2 + $0x70] sm:$0xff]  ;;  %s1767_s2 = sld [smem:[#allocation2 + $0x381]] }
 0x903   :  { %v1186_v47 = vadd.f32 %v1184_v42, %v1170_v45  ;;  %v1189_v49 = vmax.f32 %v1187_v46, 0.0  ;;  %v1493_v42 = vstv %s1770_s10 }
 0x904   :  { %v1495_v44 = vmul.f32 %v1772_v41, %v1493_v42  ;;  %v1494_v45 = vmul.f32 %v1771_v43, %v1493_v42 }
 0x905   :  { %v1188_v48 = vmax.f32 %v1186_v47, 0.0 }
 0x907   :  { %1962 = vmatprep.mubr.msk.f32.mxu0 %vm179_vm2, %v1188_v48 }
 0x908   :  { %1963 = vmatmul.mubr.msk.f32.vlgmr.msra.gmra.mxu0 %vm179_vm2, %v1189_v49 }
 0x909   :  { %1984 = vmatpush3.msra.mxu0 %v2068_v0 }
 0x90a   :  { %1985 = vmatprep.subr.mxu0 %v2073_v1 }
 0x90b   :  { %1986 = vmatpush3.msra.mxu0 %v2073_v1 }
 0x90c   :  { %1990 = vmatprep.subr.mxu0 %v2114_v16 }
 0x9c8   :  { %v1964_v50 = vpop.f32.mrf.mxu0 }
 0x9c9   :  { %v1268_v53 = vadd.f32 %v1964_v50, %v2166_v37  ;;  %v1498_v50 = vstv %s1766_s14 }
 0x9ca   :  { %v1262_v54 = vpop.f32.mrf.mxu0 }
 0x9cb   :  { %v1276_v56 = vmul.f32 %v1274_v52, %v1268_v53  ;;  %v1263_v57 = vadd.f32 %v2166_v37, %v1262_v54  ;;  %v1582_v53 = vstv %s1767_s2 }
 0x9cc   :  { %v1583_v54 = vmul.f32 %v1582_v53, %v2144_v22  ;;  %v1675_v22 = vstv %s1768_s19 }
 0x9cd   :  { %v1278_v0 = vadd.f32 %v1276_v56, %v1273_v55  ;;  %v1275_v59 = vmul.f32 %v1274_v52, %v1263_v57 }
 0x9ce   :  { %v1588_v56 = vrot.slane %v1583_v54, %v2147_v25 }
 0x9cf   :  { %1280 = vst.msk [vmem:[%s2470_s8 + $0x8] sm:$0xf] %vm55_vm1, %v1278_v0  ;;  %v1277_v1 = vadd.f32 %v1275_v59, %v1272_v58 }
 0x9d1   :  { %1279 = vst.msk [vmem:[%s2470_s8] sm:$0xff] %vm53_vm0, %v1277_v1  ;;  %v1678_v1 = vstv %s1769_s20 }
 0x9d6   :  { %v1287_v3 = vld [vmem:[%s2470_s8 + $0x8] sm:$0xf] }
 0x9d7   :  { %v1295_v5 = vadd.f32 %v1293_v63, %v1287_v3 }
 0x9d8   :  { %v1286_v4 = vld [vmem:[%s2470_s8] sm:$0xff] }
 0x9d9   :  { %v1294_v6 = vadd.f32 %v1292_v2, %v1286_v4  ;;  %v1298_v9 = vmul.f32 %v1296_v7, %v1295_v5  ;;  %v1475_v33 = vmul.f32 %v1473_v29, %v1295_v5 }
 0x9db   :  { %v1297_v8 = vmul.f32 %v1296_v7, %v1294_v6  ;;  %v1474_v38 = vmul.f32 %v1473_v29, %v1294_v6 }
 0x9dd   :  { %1969 = vmatprep.mubr.msk.f32.mxu1 %vm53_vm0, %v1297_v8 }
 0x9de   :  { %1970 = vmatmul.mubr.msk.f32.vlgmr.msra.gmra.mxu1 %vm53_vm0, %v1298_v9 }
 0x9df   :  { %1973 = vmatpush3.msra.mxu1 %v2114_v16 }
 0x9e0   :  { %1974 = vmatprep.subr.mxu1 %v2122_v17 }
 0x9e1   :  { %1975 = vmatpush3.msra.mxu1 %v2122_v17 }
 0x9e2   :  { %1976 = vmatprep.subr.mxu1 %v2129_v18 }
 0x9e3   :  { %1977 = vmatpush3.msra.mxu1 %v2129_v18 }
 0x9e4   :  { %1978 = vmatprep.subr.mxu1 %v2136_v19 }
 0x9e5   :  { %1979 = vmatpush3.msra.mxu1 %v2136_v19 }
 0xa9e   :  { %v1971_v12 = vpop.f32.mrf.mxu1 }
 0xa9f   :  { %v1377_v14 = vadd.f32 %v1971_v12, %v2152_v26 }
 0xaa0   :  { %v1371_v15 = vpop.f32.mrf.mxu1 }
 0xaa1   :  { %v1372_v20 = vadd.f32 %v2152_v26, %v1371_v15  ;;  %v1389_v21 = vadd.f32 %v1386_v13, %v1377_v14 }
 0xaa3   :  { %v1388_v23 = vadd.f32 %v1386_v13, %v1372_v20  ;;  %v1391_v27 = vmax.f32 %v1389_v21, 0.0 }
 0xaa5   :  { %v1390_v24 = vmax.f32 %v1388_v23, 0.0 }
 0xaa7   :  { %1980 = vmatprep.mubr.msk.f32.mxu1 %vm179_vm2, %v1390_v24 }
 0xaa8   :  { %1981 = vmatmul.mubr.msk.f32.vlgmr.msra.gmra.mxu1 %vm179_vm2, %v1391_v27 }
 0xb68   :  { %v1982_v28 = vpop.f32.mrf.mxu1 }
 0xb69   :  { %v1470_v31 = vadd.f32 %v1982_v28, %v2166_v37 }
 0xb6a   :  { %v1464_v32 = vpop.f32.mrf.mxu1 }
 0xb6b   :  { %v1478_v34 = vmul.f32 %v1476_v30, %v1470_v31  ;;  %v1465_v35 = vadd.f32 %v2166_v37, %v1464_v32 }
 0xb6d   :  { %v1480_v36 = vadd.f32 %v1478_v34, %v1475_v33  ;;  %v1477_v39 = vmul.f32 %v1476_v30, %v1465_v35 }
 0xb6f   :  { %1482 = vst.msk [vmem:[%s2470_s8 + $0x8] sm:$0xf] %vm55_vm1, %v1480_v36  ;;  %v1479_v40 = vadd.f32 %v1477_v39, %v1474_v38 }
 0xb71   :  { %1481 = vst.msk [vmem:[%s2470_s8] sm:$0xff] %vm53_vm0, %v1479_v40 }
 0xb76   :  { %v1489_v46 = vld [vmem:[%s2470_s8 + $0x8] sm:$0xf] }
 0xb77   :  { %v1497_v48 = vadd.f32 %v1495_v44, %v1489_v46 }
 0xb78   :  { %v1488_v47 = vld [vmem:[%s2470_s8] sm:$0xff] }
 0xb79   :  { %v1496_v49 = vadd.f32 %v1494_v45, %v1488_v47  ;;  %v1500_v52 = vmul.f32 %v1498_v50, %v1497_v48  ;;  %v1677_v61 = vmul.f32 %v1675_v22, %v1497_v48 }
 0xb7b   :  { %v1499_v51 = vmul.f32 %v1498_v50, %v1496_v49  ;;  %v1676_v2 = vmul.f32 %v1675_v22, %v1496_v49 }
 0xb7d   :  { %1987 = vmatprep.mubr.msk.f32.mxu0 %vm53_vm0, %v1499_v51 }
 0xb7e   :  { %1988 = vmatmul.mubr.msk.f32.vlgmr.msra.gmra.mxu0 %vm53_vm0, %v1500_v52 }
 0xb7f   :  { %1991 = vmatpush3.msra.mxu0 %v2114_v16 }
 0xb80   :  { %1992 = vmatprep.subr.mxu0 %v2122_v17 }
 0xb81   :  { %1993 = vmatpush3.msra.mxu0 %v2122_v17 }
 0xb82   :  { %1994 = vmatprep.subr.mxu0 %v2129_v18 }
 0xb83   :  { %1995 = vmatpush3.msra.mxu0 %v2129_v18 }
 0xb84   :  { %1996 = vmatprep.subr.mxu0 %v2136_v19 }
 0xb85   :  { %1997 = vmatpush3.msra.mxu0 %v2136_v19 }
 0xc3e   :  { %v1989_v55 = vpop.f32.mrf.mxu0 }
 0xc3f   :  { %v1579_v16 = vadd.f32 %v1989_v55, %v2152_v26 }
 0xc40   :  { %v1573_v57 = vpop.f32.mrf.mxu0 }
 0xc41   :  { %v1574_v17 = vadd.f32 %v2152_v26, %v1573_v57  ;;  %v1591_v0 = vadd.f32 %v1588_v56, %v1579_v16 }
 0xc43   :  { %v1590_v58 = vadd.f32 %v1588_v56, %v1574_v17  ;;  %v1593_v18 = vmax.f32 %v1591_v0, 0.0 }
 0xc45   :  { %v1592_v59 = vmax.f32 %v1590_v58, 0.0 }
 0xc47   :  { %1998 = vmatprep.mubr.msk.f32.mxu0 %vm179_vm2, %v1592_v59 }
 0xc48   :  { %1999 = vmatmul.mubr.msk.f32.vlgmr.msra.gmra.mxu0 %vm179_vm2, %v1593_v18 }
 0xd08   :  { %v2000_v19 = vpop.f32.mrf.mxu0 }
 0xd09   :  { %v1672_v25 = vadd.f32 %v2000_v19, %v2166_v37 }
 0xd0a   :  { %v1666_v60 = vpop.f32.mrf.mxu0 }
 0xd0b   :  { %v1680_v62 = vmul.f32 %v1678_v1, %v1672_v25  ;;  %v1667_v26 = vadd.f32 %v2166_v37, %v1666_v60 }
 0xd0d   :  { %v1682_v63 = vadd.f32 %v1680_v62, %v1677_v61  ;;  %v1679_v3 = vmul.f32 %v1678_v1, %v1667_v26 }
 0xd0f   :  { %1684 = vst.msk [vmem:[%s2470_s8 + $0x8] sm:$0xf] %vm55_vm1, %v1682_v63  ;;  %v1681_v4 = vadd.f32 %v1679_v3, %v1676_v2 }
 0xd11   :  { %1683 = vst.msk [vmem:[%s2470_s8] sm:$0xff] %vm53_vm0, %v1681_v4 }
 0xd12   :  { %1689 = vsyncpa [#allocation3], 1 }

</bundles_post_ra>
